<compile_context>
chip_gen: v5e
topology: v5e:2x2
jax: 0.10.0
libtpu: 0.0.40
codegen_flags: <defaults>
</compile_context>

<pallas_src>
import jax
import jax.numpy as jnp
from jax.experimental import pallas as pl
from jax.experimental.pallas import tpu as pltpu


def _round_up(x: int, m: int) -> int:
    return ((x + m - 1) // m) * m


def _vmem_capacity_bytes() -> int:
    """Physical VMEM on this chip; conservative 64 MiB if unknown."""
    try:
        info = pltpu.get_tpu_info()
        cap = getattr(info, "vmem_capacity_bytes", None)
        if cap:
            return int(cap)
    except Exception:
        pass
    return 64 * 1024 * 1024


def _block_spec(block_shape, index_map, n_buffers=None):
    """BlockSpec with optional explicit buffer count (falls back if the
    installed JAX does not accept pipeline_mode)."""
    if n_buffers is None:
        return pl.BlockSpec(block_shape, index_map)
    try:
        return pl.BlockSpec(block_shape, index_map,
                            pipeline_mode=pl.Buffered(n_buffers))
    except TypeError:
        return pl.BlockSpec(block_shape, index_map)


def direction_embedding_kernel(alpha_ref, z_ref, basis_ref, w_ref, b_ref,
                               h_ref, dir_ref):
    # Linear on the MXU with f32 accumulation, then ReLU.
    y = jnp.dot(basis_ref[...], w_ref[...], preferred_element_type=jnp.float32)
    y = jnp.maximum(y + b_ref[...].astype(jnp.float32), 0.0)

    # (y / max(||y||_2, 1e-12))**2  ==  y^2 / max(sum(y^2), 1e-24)
    # Exact per-row reciprocal on the (TB, 1) column, broadcast multiply over
    # the tile (TB divides instead of TB*Dp); cross-lane sum uses the XLU slot.
    ysq = y * y
    sumsq = jnp.sum(ysq, axis=-1, keepdims=True)          # (TB, 1)
    inv = 1.0 / jnp.maximum(sumsq, 1e-24)                 # exact, keeps 1e-5 parity
    d = ysq * inv

    alpha = alpha_ref[0, 0]
    h_ref[...] = (z_ref[...].astype(jnp.float32) + alpha * d).astype(h_ref.dtype)
    dir_ref[...] = d.astype(dir_ref.dtype)


def direction_embedding_forward(z, direction_basis, alpha, w_t, b,
                                *, target_tile_bytes=2 << 20, min_grid_steps=8):
    """z, direction_basis: [B, D]; alpha: scalar; w_t: [D, D] (in, out); b: [D]."""
    B, D = z.shape
    h_dtype = z.dtype
    d_dtype = direction_basis.dtype
    Dp = _round_up(D, 128)

    itemsize = lambda x: jnp.dtype(x.dtype).itemsize
    vmem_cap = _vmem_capacity_bytes()
    vmem_usable = int(vmem_cap * 0.85)          # headroom for Mosaic scratch / DMA metadata

    # Single-buffered resident weight + bias.
    resident_bytes = Dp * Dp * itemsize(w_t) + Dp * itemsize(b)
    # Bytes per batch-row for the 4 batch-tiled arrays, each double-buffered.
    row_bytes = (itemsize(z) + itemsize(direction_basis)
                 + jnp.dtype(h_dtype).itemsize + jnp.dtype(d_dtype).itemsize) * Dp * 2

    tile_budget = vmem_usable - resident_bytes - (4 << 20)
    if tile_budget < row_bytes * 8:
        # Resident (Dp, Dp) weight does not fit this chip's VMEM.
        # TODO(synk): tile W along output features on a second grid axis with a
        # two-pass normalization instead of this plain-XLA fallback.
        y = jnp.maximum(direction_basis @ w_t + b, 0.0)
        ysq = y * y
        d = ysq / jnp.maximum(jnp.sum(ysq, axis=-1, keepdims=True), 1e-24)
        return (z + alpha * d).astype(h_dtype), d.astype(d_dtype)

    # Batch tile: ~target_tile_bytes of rows, capped by the batch, by a VMEM
    # budget, and so that the grid keeps >= min_grid_steps steps when B allows
    # (keeps both v7x cores busy and gives the pipeline work to overlap).
    tb_target = max(8, _round_up(target_tile_bytes // (Dp * 4), 8))
    tb_steps = _round_up(pl.cdiv(B, min_grid_steps), 8)
    tb_vmem = max(8, ((tile_budget // row_bytes) // 8) * 8)
    TB = max(8, min(tb_target, _round_up(B, 8), tb_steps, tb_vmem))
    Bp = _round_up(B, TB)
    grid = (Bp // TB,)

    # Lane-dense layout: pad feature dim to a multiple of 128. Zero padding is
    # exact (padded y lanes are ReLU(0)=0, contribute nothing to sum(y^2),
    # direction is 0 there). Pads are skipped entirely when already aligned.
    def _pad2(x, rows, cols):
        if x.shape == (rows, cols):
            return x
        return jnp.pad(x, ((0, rows - x.shape[0]), (0, cols - x.shape[1])))

    z_p = _pad2(z, Bp, Dp)
    basis_p = _pad2(direction_basis, Bp, Dp)
    w_p = _pad2(w_t, Dp, Dp)
    b_p = b if b.shape[0] == Dp else jnp.pad(b, (0, Dp - D))
    b_p = b_p.reshape(1, Dp)
    alpha_arr = jnp.asarray(alpha, jnp.float32).reshape(1, 1)

    vmem_needed = resident_bytes + row_bytes * TB + (4 << 20)
    vmem_limit = int(min(vmem_usable, max(vmem_needed, 16 << 20)))

    cost = pl.CostEstimate(
        flops=2 * Bp * Dp * Dp,
        transcendentals=0,
        bytes_accessed=int(Bp * Dp * (itemsize(z) + itemsize(direction_basis)
                                      + jnp.dtype(h_dtype).itemsize
                                      + jnp.dtype(d_dtype).itemsize)
                           + Dp * Dp * itemsize(w_t) + Dp * itemsize(b)),
    )

    out_shapes = (
        jax.ShapeDtypeStruct((Bp, Dp), h_dtype),   # h
        jax.ShapeDtypeStruct((Bp, Dp), d_dtype),   # direction
    )

    h_p, dir_p = pl.pallas_call(
        direction_embedding_kernel,
        out_shape=out_shapes,
        grid=grid,
        in_specs=[
            pl.BlockSpec(memory_space=pltpu.SMEM),                  # alpha (1,1)
            pl.BlockSpec((TB, Dp), lambda i: (i, 0)),               # z tile
            pl.BlockSpec((TB, Dp), lambda i: (i, 0)),               # basis tile
            _block_spec((Dp, Dp), lambda i: (0, 0), n_buffers=1),   # W_T resident, single-buffered
            _block_spec((1, Dp), lambda i: (0, 0), n_buffers=1),    # bias resident, single-buffered
        ],
        out_specs=(
            pl.BlockSpec((TB, Dp), lambda i: (i, 0)),
            pl.BlockSpec((TB, Dp), lambda i: (i, 0)),
        ),
        compiler_params=pltpu.CompilerParams(
            dimension_semantics=("parallel",),     # megacore batch sharding
            vmem_limit_bytes=vmem_limit,
        ),
        cost_estimate=cost,
    )(alpha_arr, z_p, basis_p, w_p, b_p)

    if (Bp, Dp) == (B, D):
        return h_p, dir_p
    return h_p[:B, :D], dir_p[:B, :D]


def reference_forward(z, direction_basis, alpha, w_t, b):
    y = direction_basis @ w_t + b
    y = jnp.maximum(y, 0.0)
    norm = jnp.maximum(jnp.sqrt(jnp.sum(y * y, axis=-1, keepdims=True)), 1e-12)
    d = (y / norm) ** 2
    return z + alpha * d, d


if __name__ == "__main__":
    key = jax.random.PRNGKey(0)
    B, D = 16, 32   # batch=16, emb_dim=32 (small demo shapes)

    k_z, k_basis, k_w, k_b = jax.random.split(key, 4)
    z = jax.random.normal(k_z, (B, D), jnp.float32)
    direction_basis = jax.random.normal(k_basis, (B, D), jnp.float32)
    alpha = 0.5

    # nn.Linear-style init: uniform(-1/sqrt(D), 1/sqrt(D)).
    bound = 1.0 / (D ** 0.5)
    w = jax.random.uniform(k_w, (D, D), jnp.float32, -bound, bound)   # (out, in)
    b = jax.random.uniform(k_b, (D,), jnp.float32, -bound, bound)
    w_t = w.T   # (in, out) for x @ W_T

    h, direction = direction_embedding_forward(z, direction_basis, alpha, w_t, b)
    jax.block_until_ready((h, direction))

    h_ref, d_ref = reference_forward(z, direction_basis, alpha, w_t, b)
    assert jnp.allclose(h, h_ref, atol=1e-5, rtol=1e-5), \
        f"h mismatch: {jnp.max(jnp.abs(h - h_ref))}"
    assert jnp.allclose(direction, d_ref, atol=1e-5, rtol=1e-5), \
        f"direction mismatch: {jnp.max(jnp.abs(direction - d_ref))}"

    print("KERNEL_OK")
</pallas_src>

<mosaic_0001>
module attributes {stable_mosaic.version = 11 : i64} {
  func.func @direction_embedding_kernel(%arg0: i32, %arg1: memref<1x1xf32, #tpu.memory_space<smem>>, %arg2: memref<8x128xf32, #tpu.memory_space<vmem>>, %arg3: memref<8x128xf32, #tpu.memory_space<vmem>>, %arg4: memref<128x128xf32, #tpu.memory_space<vmem>>, %arg5: memref<1x128xf32, #tpu.memory_space<vmem>>, %arg6: memref<8x128xf32, #tpu.memory_space<vmem>>, %arg7: memref<8x128xf32, #tpu.memory_space<vmem>>) attributes {dimension_semantics = [#tpu.dimension_semantics<parallel>], iteration_bounds = array<i64: 2>, scalar_prefetch = 0 : i64, scratch_operands = 0 : i64, tpu.core_type = #tpu.core_type<tc>, window_params = [{transform_indices = @transform_0, window_bounds = array<i64: 1, 1>}, {transform_indices = @transform_1, window_bounds = array<i64: 8, 128>}, {transform_indices = @transform_2, window_bounds = array<i64: 8, 128>}, {pipeline_mode = #tpu.pipeline_mode<synchronous>, transform_indices = @transform_3, window_bounds = array<i64: 128, 128>}, {pipeline_mode = #tpu.pipeline_mode<synchronous>, transform_indices = @transform_4, window_bounds = array<i64: 1, 128>}, {transform_indices = @transform_5, window_bounds = array<i64: 8, 128>}, {transform_indices = @transform_6, window_bounds = array<i64: 8, 128>}]} {
    %c0 = arith.constant 0 : index
    %c0_0 = arith.constant 0 : index
    %0 = vector.load %arg3[%c0, %c0_0] : memref<8x128xf32, #tpu.memory_space<vmem>>, vector<8x128xf32>
    %c0_1 = arith.constant 0 : index
    %c0_2 = arith.constant 0 : index
    %1 = vector.load %arg4[%c0_1, %c0_2] : memref<128x128xf32, #tpu.memory_space<vmem>>, vector<128x128xf32>
    %cst = arith.constant dense<0.000000e+00> : vector<8x128xf32>
    %2 = tpu.matmul %0, %1, %cst {dimension_numbers = #tpu.dot_dimension_numbers<[1], [0], [0], [1], [0, 0, 1, 1], [], []>} : vector<8x128xf32>, vector<128x128xf32>, vector<8x128xf32> -> vector<8x128xf32>
    %c0_3 = arith.constant 0 : index
    %c0_4 = arith.constant 0 : index
    %3 = vector.load %arg5[%c0_3, %c0_4] : memref<1x128xf32, #tpu.memory_space<vmem>>, vector<1x128xf32>
    %4 = vector.broadcast %3 : vector<1x128xf32> to vector<8x128xf32>
    %5 = arith.addf %2, %4 : vector<8x128xf32>
    %cst_5 = arith.constant 0.000000e+00 : f32
    %6 = vector.broadcast %cst_5 : f32 to vector<8x128xf32>
    %7 = arith.maximumf %5, %6 : vector<8x128xf32>
    %8 = arith.mulf %7, %7 : vector<8x128xf32>
    %cst_6 = arith.constant dense<0.000000e+00> : vector<8xf32>
    %9 = vector.multi_reduction <add>, %8, %cst_6 [1] : vector<8x128xf32> to vector<8xf32>
    %10 = vector.shape_cast %9 : vector<8xf32> to vector<8x1xf32>
    %cst_7 = arith.constant 1.000000e-24 : f32
    %11 = vector.broadcast %cst_7 : f32 to vector<8x1xf32>
    %12 = arith.maximumf %10, %11 : vector<8x1xf32>
    %cst_8 = arith.constant 1.000000e+00 : f32
    %13 = vector.broadcast %cst_8 : f32 to vector<8x1xf32>
    %14 = arith.divf %13, %12 : vector<8x1xf32>
    %15 = vector.broadcast %14 : vector<8x1xf32> to vector<8x128xf32>
    %16 = arith.mulf %8, %15 : vector<8x128xf32>
    %c0_9 = arith.constant 0 : index
    %c0_10 = arith.constant 0 : index
    %17 = memref.load %arg1[%c0_9, %c0_10] : memref<1x1xf32, #tpu.memory_space<smem>>
    %c0_11 = arith.constant 0 : index
    %c0_12 = arith.constant 0 : index
    %18 = vector.load %arg2[%c0_11, %c0_12] : memref<8x128xf32, #tpu.memory_space<vmem>>, vector<8x128xf32>
    %19 = vector.broadcast %17 : f32 to vector<8x128xf32>
    %20 = arith.mulf %19, %16 : vector<8x128xf32>
    %21 = arith.addf %18, %20 : vector<8x128xf32>
    %c0_13 = arith.constant 0 : index
    %c0_14 = arith.constant 0 : index
    %22 = vector.load %arg6[%c0_13, %c0_14] : memref<8x128xf32, #tpu.memory_space<vmem>>, vector<8x128xf32>
    tpu.vector_store %arg6[%c0_13, %c0_14], %21 {strides = array<i32>} : memref<8x128xf32, #tpu.memory_space<vmem>>, vector<8x128xf32>,
    %c0_15 = arith.constant 0 : index
    %c0_16 = arith.constant 0 : index
    %23 = vector.load %arg7[%c0_15, %c0_16] : memref<8x128xf32, #tpu.memory_space<vmem>>, vector<8x128xf32>
    tpu.vector_store %arg7[%c0_15, %c0_16], %16 {strides = array<i32>} : memref<8x128xf32, #tpu.memory_space<vmem>>, vector<8x128xf32>,
    return
  }
  func.func @transform_0(%arg0: i32) -> (i32, i32) {
    %c0_i32 = arith.constant 0 : i32
    %c0_i32_0 = arith.constant 0 : i32
    %c0_i32_1 = arith.constant 0 : i32
    return %c0_i32, %c0_i32_0 : i32, i32
  }
  func.func @transform_1(%arg0: i32) -> (i32, i32) {
    %c0_i32 = arith.constant 0 : i32
    %c0_i32_0 = arith.constant 0 : i32
    return %arg0, %c0_i32 : i32, i32
  }
  func.func @transform_2(%arg0: i32) -> (i32, i32) {
    %c0_i32 = arith.constant 0 : i32
    %c0_i32_0 = arith.constant 0 : i32
    return %arg0, %c0_i32 : i32, i32
  }
  func.func @transform_3(%arg0: i32) -> (i32, i32) {
    %c0_i32 = arith.constant 0 : i32
    %c0_i32_0 = arith.constant 0 : i32
    %c0_i32_1 = arith.constant 0 : i32
    return %c0_i32, %c0_i32_0 : i32, i32
  }
  func.func @transform_4(%arg0: i32) -> (i32, i32) {
    %c0_i32 = arith.constant 0 : i32
    %c0_i32_0 = arith.constant 0 : i32
    %c0_i32_1 = arith.constant 0 : i32
    return %c0_i32, %c0_i32_0 : i32, i32
  }
  func.func @transform_5(%arg0: i32) -> (i32, i32) {
    %c0_i32 = arith.constant 0 : i32
    %c0_i32_0 = arith.constant 0 : i32
    return %arg0, %c0_i32 : i32, i32
  }
  func.func @transform_6(%arg0: i32) -> (i32, i32) {
    %c0_i32 = arith.constant 0 : i32
    %c0_i32_0 = arith.constant 0 : i32
    return %arg0, %c0_i32 : i32, i32
  }
}

</mosaic_0001>

<bundles_post_ra>
// kernel: tpu_custom_call.1
= control target key start
LH: loop header
LB: loop body
LE: loop exit
PB: predicated region body
PF: predicated region fallthrough
CT: control target
= control target key end

     0   :  { %s1104_s0 = inlined_call_operand.<no memory space> [shape: f32[1,1], index: 0, kind: input, shape index: {}]   ;;  %s1105_s1 = inlined_call_operand.hbm [shape: f32[16,128], index: 1, kind: input, shape index: {}]   ;;  %s1106_s2 = inlined_call_operand.hbm [shape: f32[16,128], index: 2, kind: input, shape index: {}]   ;;  %s1107_s3 = inlined_call_operand.hbm [shape: f32[128,128], index: 3, kind: input, shape index: {}]   ;;  %s1108_s4 = inlined_call_operand.vmem [shape: f32[1,128], index: 4, kind: input, shape index: {}]   ;;  %s1109_s5 = inlined_call_operand.hbm [shape: f32[16,128], index: 5, kind: output, shape index: {0}]   ;;  %s1110_s6 = inlined_call_operand.hbm [shape: f32[16,128], index: 6, kind: output, shape index: {1}]  }
   0x1   :  { %1114 = sst [smem:[#allocation20_spill]] %s1107_s3 }
   0x2   :  { %12 = sst [smem:[#allocation2]] %s1104_s0 }
   0x3   :  { %13 = vsyncpa [#allocation4], 0 }
   0x4   :  { %15 = vsyncpa [#allocation4 + $0x1], 0 }
   0x5   :  { %16 = vsyncpa [#allocation7], 0 }
   0x6   :  { %18 = vsyncpa [#allocation7 + $0x1], 0 }
   0x7   :  { %19 = vsyncpa [#allocation5], 0 }
   0x8   :  { %21 = vsyncpa [#allocation5 + $0x1], 0 }
   0x9   :  { %22 = vsyncpa [#allocation11], 0 }
   0xa   :  { %24 = vsyncpa [#allocation11 + $0x1], 0  ;;  %s906_s23 = smov 0   ;;  %s908_s24 = smov 0  }
   0xb   :  { %s910_s25 = smov 0   ;;  %s912_s26 = smov 0  }
   0xc LB: > { %1115 = sst [smem:[#allocation17_spill]] %s859_s25  ;;  %s930_s29 = sadd.s32 4294967295, %s863_s26   ;;  %s863_s26 = sphi %s912_s26, %s1126_s26   ;;  %s859_s25 = sphi %s910_s25, %s1128_s25   ;;  %s855_s24 = sphi %s908_s24, %s1130_s24   ;;  %s851_s23 = sphi %s906_s23, %s1129_s23  }
   0xd   : > { %s1116_s3 = sld [smem:[#allocation20_spill]]  ;;  %p576_p0 = scmp.ge.s32.totalorder %s863_s26, 1 }
   0xe   : > { %p72_p1 = scmp.eq.s32.totalorder %s930_s29, 0  ;;  %p202_p2 = scmp.lt.s32.totalorder %s863_s26, 3 }
   0xf   : > { %s865_s7 = smov [#allocation8]   ;;  %s866_s9 = smov 128  }
  0x10   : > { %p935_p3 = pnand %p576_p0, %p202_p2  ;;  %s218_s8 = sshll.u32 %s865_s7, 4  ;;  %s219_s8 = int_to_ptr.vmem [resolvable:$true] %s218_s8 }
  0x11   : > { %s867_s10 = smov 8   ;;  %s575_s11 = sadd.s32 4294967294, %s863_s26  }
  0x12   : > { %p607_p4 = pneg %p935_p3  ;;  %s946_s12 = sadd.s32 1, %s863_s26  }
  0x13   : > { %s216_s28 = sshll.u32 %s1116_s3, 4  ;;  %1118 = sst [smem:[#allocation18_spill]] %s946_s12  ;;  %s217_s28 = int_to_ptr.hbm [resolvable:$true] %s216_s28 }
  0x14   : > { %p608_p6 = pnand %p607_p4, %p72_p1  ;;  %s58_s13 = sadd.s32 1, %s859_s25 }
  0x15   : > { %s55_s14 = ssub.s32 %s863_s26, %s946_s12  ;;  %p65_p7 = scmp.ne.s32.totalorder %s859_s25, %s855_s24 }
  0x16   : > { %610 = dma.hbm_to_vmem [thread:$0]  (!%p608_p6), %s217_s28, 2048, %s219_s8, [#allocation7], %s866_s9, %s866_s9, %s867_s10  }
  0x17   : > { %p56_p8 = scmp.eq.s32.totalorder %s55_s14, 0  ;;  %p66_p9 = scmp.eq.s32.totalorder %s863_s26, 0 }
  0x18   : > { %p71_p10 = scmp.ne.s32.totalorder %s855_s24, %s851_s23  ;;  %p163_p11 = scmp.eq.s32.totalorder %s930_s29, 1 }
  0x19   : > { %s958_s15 = scalar_select %p56_p8, %s859_s25, %s58_s13  }
  0x1a   : > { %p960_p12 = por %p66_p9, %p65_p7  ;;  %p966_p13 = por %p72_p1, %p71_p10 }
  0x1b   : > { %1119 = sst [smem:[#allocation19_spill]] %s958_s15  ;;  %p970_p0 = por %p163_p11, %p65_p7 }
  0x1c   : > { %p169_p2 = scmp.eq.s32.totalorder %s575_s11, 1  ;;  %p626_p4 = scmp.lt.s32.totalorder %s863_s26, 2 }
  0x1d   : > { %s235_s19 = sand.u32 1, %s859_s25   ;;  %s580_s22 = sshll.u32 %s863_s26, 3 }
  0x1e   : > { %p976_p6 = por %p169_p2, %p71_p10  ;;  %s579_s21 = sshll.u32 %s235_s19, 3 }
  0x1f   : > { %s243_s28 = scalar_lea.hbm %s1105_s1, %s580_s22  ;;  %s239_s8 = scalar_lea.vmem [#allocation3], %s579_s21 }
  0x20   : > { %s245_s7 = sshll.u32 %s243_s28, 4  ;;  %s247_s9 = sshll.u32 %s239_s8, 4  ;;  %s246_s7 = int_to_ptr.hbm [resolvable:$true] %s245_s7  ;;  %s248_s9 = int_to_ptr.vmem [resolvable:$true] %s247_s9 }
  0x21   : > { %p986_p7 = pnand %p626_p4, %p960_p12  ;;  %s262_s14 = scalar_lea.hbm %s1106_s2, %s580_s22 }
  0x22   : > { %s254_s3 = sand.u32 1, %s863_s26   ;;  %s236_s15 = scalar_lea.sflag [#allocation4], %s235_s19 }
  0x23   : > { %s697_s0 = sshra.s32 %s246_s7, 4  ;;  %p701_p9 = pneg %p986_p7  ;;  %s698_s0 = int_to_ptr.hbm [resolvable:$true] %s697_s0 }
  0x24   : > { %s699_s27 = scalar_lea.hbm %s698_s0, 8  ;;  %s704_s8 = scalar_lea.hbm %s1105_s1, 16 }
  0x25   : > { %p700_p8 = scmp.ne.s32.totalorder %s698_s0, %s699_s27  ;;  %p705_p12 = scmp.lt.s32.totalorder %s698_s0, %s1105_s1 }
  0x26   : > { %p706_p2 = scmp.lt.s32.totalorder %s704_s8, %s699_s27 }
  0x27   : > { %p702_p10 = pnand %p701_p9, %p700_p8 }
  0x28   : > { %p707_p4 = por %p706_p2, %p705_p12 }
  0x29   : > { %p703_p11 = pneg %p702_p10 }
  0x2b   : > { %p708_p5 = pnand %p707_p4, %p703_p11 }
  0x2d   : > { %711 = shalt.err (!%p708_p5)
}
  0x2e   : > { %614 = dma.hbm_to_vmem [thread:$0]  (!%p986_p7), %s246_s7, 128, %s248_s9, %s236_s15  }
  0x2f   : > { %s264_s19 = sshll.u32 %s262_s14, 4  ;;  %s258_s22 = scalar_lea.vmem [#allocation6], %s579_s21  ;;  %s265_s19 = int_to_ptr.hbm [resolvable:$true] %s264_s19 }
  0x30   : > { %s266_s25 = sshll.u32 %s258_s22, 4  ;;  %s255_s12 = scalar_lea.sflag [#allocation7], %s254_s3  ;;  %s267_s25 = int_to_ptr.vmem [resolvable:$true] %s266_s25 }
  0x31   : > { %s727_s16 = sshra.s32 %s265_s19, 4  ;;  %s734_s8 = scalar_lea.hbm %s1106_s2, 16  ;;  %s728_s16 = int_to_ptr.hbm [resolvable:$true] %s727_s16 }
  0x32   : > { %s729_s28 = scalar_lea.hbm %s728_s16, 8  ;;  %p735_p5 = scmp.lt.s32.totalorder %s728_s16, %s1106_s2 }
  0x33   : > { %p730_p8 = scmp.ne.s32.totalorder %s728_s16, %s729_s28  ;;  %p736_p11 = scmp.lt.s32.totalorder %s734_s8, %s729_s28 }
  0x35   : > { %p732_p10 = pnand %p730_p8, %p701_p9  ;;  %p737_p2 = por %p736_p11, %p735_p5 }
  0x37   : > { %p733_p12 = pneg %p732_p10 }
  0x39   : > { %p738_p4 = pnand %p737_p2, %p733_p12 }
  0x3b   : > { %741 = shalt.err (!%p738_p4)
}
  0x3c   : > { %617 = dma.hbm_to_vmem [thread:$0]  (!%p986_p7), %s265_s19, 128, %s267_s25, %s255_s12  }
  0x3d   : > { %275 = sbr.rel (%p935_p3) target bundleno = 388 (0x184), region = 40  ;;  %s1021_s3 = sand.u32 (!%p935_p3), 1, %s855_s24  }
  0x3e   : > { %s1024_s21 = sshll.u32 (!%p935_p3), %s1021_s3, 3  ;;  %s278_s7 = scalar_lea.sflag (!%p935_p3), [#allocation4], %s1021_s3 }
  0x3f   : > { %s281_s9 = scalar_lea.vmem (!%p935_p3), [#allocation3], %s1024_s21 }
  0x42   : > { %830 = dma.done.wait (%p966_p13), %s278_s7, 128  }
  0x43   : > { %832 = vsyncadd (%p966_p13), %s278_s7, 4294967168  ;;  %s287_s25 = sand.u32 1, %s930_s29   ;;  %s291_s12 = scalar_lea.vmem [#allocation6], %s1024_s21 }
  0x44   : > { %s288_s30 = scalar_lea.sflag [#allocation7], %s287_s25 }
  0x45   : > { %834 = dma.done.wait (%p966_p13), %s288_s30, 128  }
  0x46   : > { %836 = vsyncadd (%p966_p13), %s288_s30, 4294967168 }
  0x47   : > { %838 = dma.done.wait (%p72_p1), [#allocation7], 2048  }
  0x48   : > { %840 = vsyncadd (%p72_p1), [#allocation7], 4294965248  ;;  %v352_v0 = vld [vmem:[#allocation8 + $0x78] sm:$0xff]  ;;  %v351_v1 = vld [vmem:[#allocation8 + $0x70] sm:$0xff]  ;;  %s398_s14 = sld [smem:[#allocation2]]  ;;  %s591_s13 = sshll.u32 %s930_s29, 3 }
  0x49   : > { %357 = vmatpush.msra.mxu0 %v352_v0  ;;  %v350_v2 = vld [vmem:[#allocation8 + $0x68] sm:$0xff]  ;;  %v349_v3 = vld [vmem:[#allocation8 + $0x60] sm:$0xff]  ;;  %v348_v4 = vld [vmem:[#allocation8 + $0x58] sm:$0xff]  ;;  %s435_s16 = scalar_lea.hbm %s1110_s6, %s591_s13  ;;  %s335_s28 = scalar_lea.vmem [#allocation10], %s1024_s21 }
  0x4a   : > { %v347_v5 = vld [vmem:[#allocation8 + $0x50] sm:$0xff]  ;;  %v346_v6 = vld [vmem:[#allocation8 + $0x48] sm:$0xff]  ;;  %v345_v7 = vld [vmem:[#allocation8 + $0x40] sm:$0xff]  ;;  %s1052_s0 = sshll.u32 %s335_s28, 4  ;;  %s439_s29 = sshll.u32 %s435_s16, 4  ;;  %s438_s0 = int_to_ptr.vmem [resolvable:$true] %s1052_s0  ;;  %s440_s29 = int_to_ptr.hbm [resolvable:$true] %s439_s29 }
  0x4b   : > { %358 = vmatpush.msra.mxu0 %v351_v1  ;;  %v344_v8 = vld [vmem:[#allocation8 + $0x38] sm:$0xff]  ;;  %v343_v9 = vld [vmem:[#allocation8 + $0x30] sm:$0xff]  ;;  %v342_v10 = vld [vmem:[#allocation8 + $0x28] sm:$0xff]  ;;  %s421_s11 = scalar_lea.hbm %s1109_s5, %s591_s13  ;;  %s328_s15 = scalar_lea.vmem [#allocation9], %s1024_s21 }
  0x4c   : > { %v341_v11 = vld [vmem:[#allocation8 + $0x20] sm:$0xff]  ;;  %v340_v12 = vld [vmem:[#allocation8 + $0x18] sm:$0xff]  ;;  %v339_v13 = vld [vmem:[#allocation8 + $0x10] sm:$0xff]  ;;  %s1061_s7 = sshll.u32 %s328_s15, 4  ;;  %s425_s25 = sshll.u32 %s421_s11, 4  ;;  %s424_s7 = int_to_ptr.vmem [resolvable:$true] %s1061_s7  ;;  %s426_s25 = int_to_ptr.hbm [resolvable:$true] %s425_s25 }
  0x4d   : > { %359 = vmatpush.msra.mxu0 %v350_v2  ;;  %v338_v14 = vld [vmem:[#allocation8 + $0x8] sm:$0xff]  ;;  %v337_v15 = vld [vmem:[#allocation8] sm:$0xff]  ;;  %v336_v16 = vld [vmem:[%s291_s12] sm:$0xff]  ;;  %s411_s30 = scalar_lea.sflag [#allocation11], %s1021_s3  ;;  %s771_s12 = sshra.s32 %s440_s29, 4  ;;  %s772_s12 = int_to_ptr.hbm [resolvable:$true] %s771_s12 }
  0x4e   : > { %v664_v17 = vld [vmem:[%s1108_s4] ss:$0 sm:$0xff]  ;;  %v400_v34 = vstv %s398_s14  ;;  %s773_s17 = scalar_lea.hbm %s772_s12, 8  ;;  %s777_s13 = scalar_lea.hbm %s1110_s6, 16 }
  0x4f   : > { %360 = vmatpush.msra.mxu0 %v349_v3  ;;  %v399_v36 = vld [vmem:[%s281_s9] sm:$0xff]  ;;  %p774_p1 = scmp.ne.s32.totalorder %s772_s12, %s773_s17  ;;  %p778_p7 = scmp.lt.s32.totalorder %s772_s12, %s1110_s6 }
  0x50   : > { %p779_p9 = scmp.lt.s32.totalorder %s777_s13, %s773_s17 }
  0x51   : > { %361 = vmatpush.msra.mxu0 %v348_v4  ;;  %p775_p3 = pnand %p774_p1, %p970_p0 }
  0x52   : > { %p780_p8 = por %p779_p9, %p778_p7 }
  0x53   : > { %362 = vmatpush.msra.mxu0 %v347_v5  ;;  %p776_p13 = pneg %p775_p3 }
  0x55   : > { %363 = vmatpush.msra.mxu0 %v346_v6  ;;  %p781_p10 = pnand %p780_p8, %p776_p13 }
  0x57   : > { %364 = vmatpush.msra.mxu0 %v345_v7 }
  0x59   : > { %365 = vmatpush.msra.mxu0 %v344_v8 }
  0x5b   : > { %366 = vmatpush.msra.mxu0 %v343_v9 }
  0x5d   : > { %367 = vmatpush.msra.mxu0 %v342_v10 }
  0x5f   : > { %368 = vmatpush.msra.mxu0 %v341_v11 }
  0x61   : > { %369 = vmatpush.msra.mxu0 %v340_v12 }
  0x63   : > { %370 = vmatpush.msra.mxu0 %v339_v13 }
  0x65   : > { %371 = vmatpush.msra.mxu0 %v338_v14 }
  0x67   : > { %372 = vmatpush.msra.mxu0 %v337_v15 }
  0x68   : > { %373 = vmatmul.f32.vlgmr.msra.gmra.mxu0 %v336_v16 }
  0xe5   : > { %v374_v18 = vpop.f32.mrf.mxu0 }
  0xe6   : > { %v375_v19 = vadd.f32 %v664_v17, %v374_v18 }
  0xe8   : > { %v377_v20 = vmax.f32 %v375_v19, 0.0 }
  0xea   : > { %v378_v21 = vmul.f32 %v377_v20, %v377_v20 }
  0xec   : > { %379 = vadd.xlane.f32.xlu0 %v378_v21 }
 0x15f   : > { %v380_v22 = vpop.xlane.xlu0 %379 }
 0x160   : > { %v381_v23 = vmax.f32 %v380_v22, 1e-24 }
 0x162   : > { %665 = vrcp.f32 %v381_v23  ;;  %v393_v27 = vand.u32 2147483648, %v381_v23  ;;  %v391_v29 = vand.u32 2147483647, %v381_v23  ;;  %vm387_vm1 = vweird.f32 %v381_v23 }
 0x164   : > { %v394_v31 = vor.u32 1.1754944e-38, %v393_v27  ;;  %vm392_vm3 = vcmp.eq.f32.partialorder %v391_v29, 8.507059e+37 }
 0x168   : > { %v666_v24 = vpop.eup %665 }
 0x169   : > { %v383_v25 = vmul.f32 %v666_v24, %v381_v23  ;;  %vm388_vm0 = vweird.f32 %v666_v24 }
 0x16a   : > { %vm389_vm2 = vmor %vm387_vm1, %vm388_vm0 }
 0x16b   : > { %v384_v26 = vsub.f32 1.0, %v383_v25 }
 0x16d   : > { %v385_v28 = vmul.f32 %v666_v24, %v384_v26 }
 0x16f   : > { %v386_v30 = vadd.f32 %v666_v24, %v385_v28 }
 0x171   : > { %v390_v32 = vsel %vm389_vm2, %v666_v24, %v386_v30 }
 0x172   : > { %v395_v33 = vsel %vm392_vm3, %v394_v31, %v390_v32 }
 0x173   : > { %v397_v35 = vmul.f32 %v395_v33, %v378_v21 }
 0x175   : > { %v401_v37 = vmul.f32 %v400_v34, %v397_v35  ;;  %404 = vst [vmem:[%s335_s28] sm:$0xff] %v397_v35 }
 0x176   : > { %784 = shalt.err (!%p781_p10)
}
 0x177   : > { %604 = dma.vmem_to_hbm [thread:$0]  (%p970_p0), %s438_s0, 128, %s440_s29, %s411_s30   ;;  %v402_v38 = vadd.f32 %v401_v37, %v399_v36 }
 0x178   : > { %s406_s21 = scalar_lea.sflag [#allocation5], %s1021_s3  ;;  %s799_s22 = sshra.s32 %s426_s25, 4  ;;  %s800_s22 = int_to_ptr.hbm [resolvable:$true] %s799_s22 }
 0x179   : > { %403 = vst [vmem:[%s328_s15] sm:$0xff] %v402_v38  ;;  %s801_s16 = scalar_lea.hbm %s800_s22, 8  ;;  %s805_s8 = scalar_lea.hbm %s1109_s5, 16 }
 0x17a   : > { %p802_p12 = scmp.ne.s32.totalorder %s800_s22, %s801_s16  ;;  %p806_p2 = scmp.lt.s32.totalorder %s800_s22, %s1109_s5 }
 0x17b   : > { %p807_p4 = scmp.lt.s32.totalorder %s805_s8, %s801_s16 }
 0x17c   : > { %p803_p5 = pnand %p802_p12, %p970_p0 }
 0x17d   : > { %p808_p1 = por %p807_p4, %p806_p2 }
 0x17e   : > { %p804_p11 = pneg %p803_p5 }
 0x180   : > { %p809_p3 = pnand %p808_p1, %p804_p11 }
 0x182   : > { %812 = shalt.err (!%p809_p3)
}
 0x183   : > { %603 = dma.vmem_to_hbm [thread:$0]  (%p970_p0), %s424_s7, 128, %s426_s25, %s406_s21  }
 0x184 PF: > { %s451_s3 = sand.u32 1, %s851_s23   ;;  %p1125_p13 = scmp.ge.s32.totalorder %s863_s26, 2 }
 0x185   : > { %s452_s0 = scalar_lea.sflag [#allocation5], %s451_s3 }
 0x186   : > { %p619_p7 = pnand %p1125_p13, %p976_p6 }
 0x188   : > { %p620_p9 = pneg %p619_p7 }
 0x18a   : > { %842 = dma.done.wait (%p620_p9), %s452_s0, 128  }
 0x18b   : > { %844 = vsyncadd (%p620_p9), %s452_s0, 4294967168  ;;  %s462_s29 = scalar_lea.sflag [#allocation11], %s451_s3 }
 0x18c   : > { %846 = dma.done.wait (%p620_p9), %s462_s29, 128  }
 0x18d   : > { %848 = vsyncadd (%p620_p9), %s462_s29, 4294967168  ;;  %s1126_s26 = sld [smem:[#allocation18_spill]]  ;;  %s1129_s23 = smov %s855_s24 }
 0x18e   : > { %s1127_s15 = sld [smem:[#allocation17_spill]] }
 0x18f   : > { %s1128_s25 = sld [smem:[#allocation19_spill]] }
 0x193   : > { %p27_p0 = scmp.ge.s32.totalorder %s1126_s26, 4  }
 0x194   : > { %s1130_s24 = smov %s1127_s15 }
 0x195   :  { %29 = sbr.rel (!%p27_p0) target bundleno = 12 (0xc), region = 119 }
 0x19a   :  { %468 = vsyncpa [#allocation4], 1 }
 0x19b   :  { %470 = vsyncpa [#allocation4 + $0x1], 1 }
 0x19c   :  { %471 = vsyncpa [#allocation7], 1 }
 0x19d   :  { %473 = vsyncpa [#allocation7 + $0x1], 1 }
 0x19e   :  { %474 = vsyncpa [#allocation5], 1 }
 0x19f   :  { %476 = vsyncpa [#allocation5 + $0x1], 1 }
 0x1a0   :  { %477 = vsyncpa [#allocation11], 1 }
 0x1a1   :  { %479 = vsyncpa [#allocation11 + $0x1], 1 }

</bundles_post_ra>
